<compile_context>
chip_gen: v6e
topology: v6e:2x2x1
jax: 0.10.0
libtpu: 0.0.40
codegen_flags: <defaults>
</compile_context>

<pallas_src>
import jax
import jax.numpy as jnp
from jax.experimental import pallas as pl
from jax.experimental.pallas import tpu as pltpu

_LANE = 128


def _decoder_kernel(w_ref, b_ref, x_ref, o_ref):
    # w_ref: (N, K), b_ref: (N, 1), x_ref: (tm, K) in natural row layout.
    # Contract over K so the row axis lands on lanes: logits_T is (N, tm).
    logits = jax.lax.dot_general(
        w_ref[...], x_ref[...],
        dimension_numbers=(((1,), (1,)), ((), ())),
        preferred_element_type=jnp.float32,
    )
    logits = logits + b_ref[...]                       # (N, tm) + (N, 1)

    # Numerically-stable softmax over the tag (sublane) axis; N is fully
    # resident so this is exact.  Exact division so each row sums to 1.
    # TODO(synk): on v7x, the sum could be moved to the idle MXU
    # (ones(1,N) @ e) to relieve XLU pressure; on v5e/v6e it is irrelevant.
    m = jnp.max(logits, axis=0, keepdims=True)         # (1, tm)
    e = jnp.exp(logits - m)                            # (N, tm)
    denom = jnp.sum(e, axis=0, keepdims=True)          # (1, tm)
    probs_t = e / denom                                # exact normalization

    # In-kernel transpose (XLU) -> stored tile is already (rows, tags).
    o_ref[...] = probs_t.T.astype(o_ref.dtype)


def decoder_forward(x, weight, bias, *, tm=2048):
    """x: (..., K) float32; weight: (N, K) as in nn.Linear; bias: (N,)."""
    orig_shape = x.shape
    K = orig_shape[-1]
    N = weight.shape[0]

    x2d = x.reshape(-1, K)
    M = x2d.shape[0]

    # Row tile sits on the second-to-last dim of both the x block and the
    # output block, so it only needs sublane (8) alignment — we keep it a
    # multiple of 128 when M is large so the in-kernel (N, tm) logits tile is
    # lane-dense.  Small M: one block equal to the full row extent (always a
    # legal block shape).  Large M: cap the tile so the grid has >= 2 steps,
    # letting v7x megacore shard the row loop across its 2 TensorCores.
    if M <= _LANE:
        tm_eff = M
    else:
        tm_eff = max(_LANE, (tm // _LANE) * _LANE)
        half = max(_LANE, (pl.cdiv(M, _LANE) // 2) * _LANE)
        tm_eff = min(tm_eff, half)
    grid = (pl.cdiv(M, tm_eff),)

    b2d = bias.reshape(N, 1)

    # Per-step VMEM footprint is ~(K + 2*N) * tm * 4 * 2 (double-buffered),
    # well under scoped VMEM on all generations — no vmem_limit_bytes needed.
    out = pl.pallas_call(
        _decoder_kernel,
        out_shape=jax.ShapeDtypeStruct((M, N), x.dtype),
        grid_spec=pltpu.PrefetchScalarGridSpec(
            num_scalar_prefetch=0,
            grid=grid,
            in_specs=[
                pl.BlockSpec((N, K), lambda i: (0, 0)),        # weight: grid-invariant
                pl.BlockSpec((N, 1), lambda i: (0, 0)),        # bias: grid-invariant
                pl.BlockSpec((tm_eff, K), lambda i: (i, 0)),   # x: natural layout, streamed
            ],
            out_specs=pl.BlockSpec((tm_eff, N), lambda i: (i, 0)),
        ),
        compiler_params=pltpu.CompilerParams(
            dimension_semantics=("parallel",)),                # rows independent
        cost_estimate=pl.CostEstimate(
            flops=2 * M * N * K + 5 * M * N,
            transcendentals=M * N,
            bytes_accessed=(M * K + M * N + N * K + N) * 4,
        ),
    )(weight, b2d, x2d)

    return out.reshape(*orig_shape[:-1], N)


if __name__ == "__main__":
    # Small shapes consistent with the module: batch=2, seq=8, input_size=32, tag_nums=16
    input_size, tag_nums = 32, 16
    key = jax.random.PRNGKey(0)
    kx, kw, kb = jax.random.split(key, 3)

    x = jax.random.normal(kx, (2, 8, input_size), dtype=jnp.float32)
    # Deterministic nn.Linear-style init (uniform in +/- 1/sqrt(K))
    bound = 1.0 / (input_size ** 0.5)
    weight = jax.random.uniform(kw, (tag_nums, input_size),
                                minval=-bound, maxval=bound, dtype=jnp.float32)
    bias = jax.random.uniform(kb, (tag_nums,),
                              minval=-bound, maxval=bound, dtype=jnp.float32)

    y = decoder_forward(x, weight, bias)
    jax.block_until_ready(y)

    # Reference check in plain JAX.
    ref = jax.nn.softmax(x @ weight.T + bias, axis=-1)
    assert y.shape == (2, 8, tag_nums)
    assert jnp.allclose(y, ref, atol=2e-3, rtol=2e-3)
    assert jnp.allclose(jnp.sum(y, axis=-1), 1.0, atol=1e-3)

    # Second check: M not a multiple of the tile + multi-step grid + ragged
    # last block (M=400 -> tm=256, grid=(2,)).
    x2 = jax.random.normal(jax.random.PRNGKey(1), (4, 100, input_size), dtype=jnp.float32)
    y2 = decoder_forward(x2, weight, bias)
    jax.block_until_ready(y2)
    ref2 = jax.nn.softmax(x2 @ weight.T + bias, axis=-1)
    assert y2.shape == (4, 100, tag_nums)
    assert jnp.allclose(y2, ref2, atol=2e-3, rtol=2e-3)
    assert jnp.allclose(jnp.sum(y2, axis=-1), 1.0, atol=1e-3)

    print("KERNEL_OK")
</pallas_src>

<mosaic_0001>
module attributes {stable_mosaic.version = 11 : i64} {
  func.func @_decoder_kernel(%arg0: i32, %arg1: memref<16x32xf32, #tpu.memory_space<vmem>>, %arg2: memref<16x1xf32, #tpu.memory_space<vmem>>, %arg3: memref<16x32xf32, #tpu.memory_space<vmem>>, %arg4: memref<16x16xf32, #tpu.memory_space<vmem>>) attributes {dimension_semantics = [#tpu.dimension_semantics<parallel>], iteration_bounds = array<i64: 1>, scalar_prefetch = 0 : i64, scratch_operands = 0 : i64, tpu.core_type = #tpu.core_type<tc>, window_params = [{pipeline_mode = #tpu.pipeline_mode<synchronous>, transform_indices = @transform_0, window_bounds = array<i64: 16, 32>}, {pipeline_mode = #tpu.pipeline_mode<synchronous>, transform_indices = @transform_1, window_bounds = array<i64: 16, 1>}, {transform_indices = @transform_2, window_bounds = array<i64: 16, 32>}, {transform_indices = @transform_3, window_bounds = array<i64: 16, 16>}]} {
    %c0 = arith.constant 0 : index
    %c0_0 = arith.constant 0 : index
    %0 = vector.load %arg1[%c0, %c0_0] : memref<16x32xf32, #tpu.memory_space<vmem>>, vector<16x32xf32>
    %c0_1 = arith.constant 0 : index
    %c0_2 = arith.constant 0 : index
    %1 = vector.load %arg3[%c0_1, %c0_2] : memref<16x32xf32, #tpu.memory_space<vmem>>, vector<16x32xf32>
    %cst = arith.constant dense<0.000000e+00> : vector<16x16xf32>
    %2 = tpu.matmul %0, %1, %cst {dimension_numbers = #tpu.dot_dimension_numbers<[1], [1], [0], [0], [0, 0, 1, 0], [], []>} : vector<16x32xf32>, vector<16x32xf32>, vector<16x16xf32> -> vector<16x16xf32>
    %c0_3 = arith.constant 0 : index
    %c0_4 = arith.constant 0 : index
    %3 = vector.load %arg2[%c0_3, %c0_4] : memref<16x1xf32, #tpu.memory_space<vmem>>, vector<16x1xf32>
    %4 = vector.broadcast %3 : vector<16x1xf32> to vector<16x16xf32>
    %5 = arith.addf %2, %4 : vector<16x16xf32>
    %cst_5 = arith.constant dense<0xFF800000> : vector<16xf32>
    %6 = vector.multi_reduction <maximumf>, %5, %cst_5 [0] : vector<16x16xf32> to vector<16xf32>
    %7 = vector.shape_cast %6 : vector<16xf32> to vector<1x16xf32>
    %8 = vector.broadcast %7 : vector<1x16xf32> to vector<16x16xf32>
    %9 = arith.subf %5, %8 : vector<16x16xf32>
    %10 = math.exp %9 : vector<16x16xf32>
    %cst_6 = arith.constant dense<0.000000e+00> : vector<16xf32>
    %11 = vector.multi_reduction <add>, %10, %cst_6 [0] : vector<16x16xf32> to vector<16xf32>
    %12 = vector.shape_cast %11 : vector<16xf32> to vector<1x16xf32>
    %13 = vector.broadcast %12 : vector<1x16xf32> to vector<16x16xf32>
    %14 = arith.divf %10, %13 : vector<16x16xf32>
    %15 = tpu.transpose %14, [1, 0] : vector<16x16xf32> -> vector<16x16xf32>
    %c0_7 = arith.constant 0 : index
    %c0_8 = arith.constant 0 : index
    %16 = vector.load %arg4[%c0_7, %c0_8] : memref<16x16xf32, #tpu.memory_space<vmem>>, vector<16x16xf32>
    tpu.vector_store %arg4[%c0_7, %c0_8], %15 {strides = array<i32>} : memref<16x16xf32, #tpu.memory_space<vmem>>, vector<16x16xf32>,
    return
  }
  func.func @transform_0(%arg0: i32) -> (i32, i32) {
    %c0_i32 = arith.constant 0 : i32
    %c0_i32_0 = arith.constant 0 : i32
    %c0_i32_1 = arith.constant 0 : i32
    return %c0_i32, %c0_i32_0 : i32, i32
  }
  func.func @transform_1(%arg0: i32) -> (i32, i32) {
    %c0_i32 = arith.constant 0 : i32
    %c0_i32_0 = arith.constant 0 : i32
    %c0_i32_1 = arith.constant 0 : i32
    return %c0_i32, %c0_i32_0 : i32, i32
  }
  func.func @transform_2(%arg0: i32) -> (i32, i32) {
    %c0_i32 = arith.constant 0 : i32
    %c0_i32_0 = arith.constant 0 : i32
    return %arg0, %c0_i32 : i32, i32
  }
  func.func @transform_3(%arg0: i32) -> (i32, i32) {
    %c0_i32 = arith.constant 0 : i32
    %c0_i32_0 = arith.constant 0 : i32
    return %arg0, %c0_i32 : i32, i32
  }
}

</mosaic_0001>

<bundles_post_ra>
// kernel: tpu_custom_call.1
= control target key start
LH: loop header
LB: loop body
LE: loop exit
PB: predicated region body
PF: predicated region fallthrough
CT: control target
= control target key end

     0   :  { %8 = vsyncpa [#allocation3], 0  ;;  %s339_s0 = inlined_call_operand.vmem [shape: f32[16,32], index: 0, kind: input, shape index: {}]   ;;  %s340_s1 = inlined_call_operand.vmem [shape: f32[16,1], index: 1, kind: input, shape index: {}]   ;;  %s341_s2 = inlined_call_operand.hbm [shape: f32[16,32], index: 2, kind: input, shape index: {}]   ;;  %s342_s3 = inlined_call_operand.hbm [shape: f32[16,16], index: 3, kind: output, shape index: {}]  }
   0x1   :  { %9 = vsyncpa [#allocation4], 0  ;;  %s284_s12 = smov [#allocation2]  }
   0x2   :  { %s19_s13 = sshll.u32 %s284_s12, 4  ;;  %s20_s13 = int_to_ptr.vmem [resolvable:$true] %s19_s13 }
   0x3   :  { %s248_s14 = scalar_lea.vmem %s20_s13, 256  ;;  %p253_p1 = scmp.lt.s32.totalorder %s20_s13, %s20_s13 }
   0x4   :  { %p249_p0 = scmp.ne.s32.totalorder %s20_s13, %s248_s14  ;;  %p254_p2 = scmp.lt.s32.totalorder %s248_s14, %s248_s14 }
   0x6   :  { %p255_p3 = por %p254_p2, %p253_p1 }
   0x8   :  { %p256_p4 = pnand %p255_p3, %p249_p0 }
   0xa   :  { %259 = shalt.err (!%p256_p4)
}
   0xb   :  { %s285_s15 = smov 128   ;;  %s286_s16 = smov 8  }
   0xc   :  { %25 = dma.hbm_to_vmem [thread:$0]  %s341_s2, 256, %s20_s13, [#allocation3], %s285_s15, %s285_s15, %s286_s16  }
   0xd   :  { %280 = dma.done.wait [#allocation3], 256  }
   0xe   :  { %281 = vsyncadd [#allocation3], 4294967040  ;;  %v287_v0 = vmov 0   ;;  %vm45_vm0 = vcmask 261120   ;;  %v32_v1 = vld [vmem:[#allocation2 + $0x8] sm:$0xff]  ;;  %v31_v2 = vld [vmem:[#allocation2] sm:$0xff] }
   0xf   :  { %233 = vset.pattern.permute.xlu0 %v287_v0  ;;  %v29_v3 = vld [vmem:[%s339_s0] sm:$0xff]  ;;  %220 = vmatprep.subr.msk.mxu0 %vm45_vm0, %v32_v1  ;;  %v34_v5 = vld [vmem:[%s340_s1 + $0x8] sm:$0xff]  ;;  %vm133_vm1 = vcmask 130048  }
  0x10   :  { %224 = vmatprep.mubr.msk.f32.mxu0 %vm45_vm0, %v29_v3  ;;  %v33_v4 = vld [vmem:[%s340_s1] sm:$0xff]  ;;  %221 = vmatpush3.xpose.msk.msra.mxu0 %vm45_vm0, %v32_v1  ;;  %v30_v6 = vld [vmem:[%s339_s0 + $0x8] sm:$0xff]  ;;  %s288_s0 = smov [#allocation5]  }
  0x11   :  { %37 = vperm.xlu0 %233, %v33_v4   ;;  %222 = vmatprep.subr.msk.mxu0 %vm45_vm0, %v31_v2  ;;  %s200_s1 = sshll.u32 %s288_s0, 4  ;;  %s201_s1 = int_to_ptr.vmem [resolvable:$true] %s200_s1 }
  0x12   :  { %s260_s26 = scalar_lea.vmem %s201_s1, 256  ;;  %p265_p6 = scmp.lt.s32.totalorder %s201_s1, %s201_s1 }
  0x13   :  { %p261_p5 = scmp.ne.s32.totalorder %s201_s1, %s260_s26  ;;  %p266_p7 = scmp.lt.s32.totalorder %s260_s26, %s260_s26 }
  0x14   :  { %223 = vmatpush3.xpose.msk.msra.mxu0 %vm45_vm0, %v31_v2 }
  0x15   :  { %42 = vperm.xlu0 %233, %v34_v5   ;;  %p267_p8 = por %p266_p7, %p265_p6 }
  0x17   :  { %225 = vmatmul.mubr.msk.f32.vlgmr.msra.gmra.mxu0 %vm45_vm0, %v30_v6  ;;  %p268_p9 = pnand %p267_p8, %p261_p5 }
  0x8c   :  { %v38_v7 = vpop.permute.xlu0 %37 }
  0x90   :  { %v43_v8 = vpop.permute.xlu0 %42 }
  0xd7   :  { %v226_v9 = vpop.f32.mrf.mxu0 }
  0xd8   :  { %v130_v10 = vadd.f32 %v226_v9, %v43_v8 }
  0xd9   :  { %v124_v11 = vpop.f32.mrf.mxu0 }
  0xda   :  { %v125_v12 = vadd.f32 %v124_v11, %v38_v7  ;;  %v135_v13 = vsel %vm133_vm1, %v130_v10, -inf }
  0xdc   :  { %v134_v14 = vsel %vm133_vm1, %v125_v12, -inf }
  0xdd   :  { %v136_v15 = vmax.f32 %v134_v14, %v135_v13 }
  0xdf   :  { %v137_v16 = vrot.slane %v136_v15, 4 }
  0xe1   :  { %v138_v17 = vmax.f32 %v136_v15, %v137_v16 }
  0xe3   :  { %v139_v18 = vrot.slane %v138_v17, 2 }
  0xe5   :  { %v140_v19 = vmax.f32 %v138_v17, %v139_v18 }
  0xe7   :  { %v141_v20 = vrot.slane %v140_v19, 1 }
  0xe9   :  { %v142_v21 = vmax.f32 %v140_v19, %v141_v20 }
  0xeb   :  { %v143_v22 = vsub.f32 %v125_v12, %v142_v21  ;;  %v144_v23 = vsub.f32 %v130_v10, %v142_v21 }
  0xed   :  { %v145_v24 = vmul.f32 1.442695, %v143_v22  ;;  %v147_v25 = vmul.f32 1.442695, %v144_v23 }
  0xef   :  { %234 = vpow2.f32 %v145_v24 }
  0xf0   :  { %236 = vpow2.f32 %v147_v25 }
  0xfc   :  { %v235_v26 = vpop.eup %234 }
  0xfd   :  { %v237_v27 = vpop.eup %236  ;;  %v149_v28 = vsel %vm133_vm1, %v235_v26, 0.0 }
  0xfe   :  { %v150_v29 = vsel %vm133_vm1, %v237_v27, 0.0 }
  0xff   :  { %v151_v30 = vadd.f32 %v150_v29, %v149_v28 }
 0x101   :  { %v152_v31 = vrot.slane %v151_v30, 4 }
 0x103   :  { %v153_v32 = vadd.f32 %v152_v31, %v151_v30 }
 0x105   :  { %v154_v33 = vrot.slane %v153_v32, 2 }
 0x107   :  { %v155_v34 = vadd.f32 %v154_v33, %v153_v32 }
 0x109   :  { %v156_v35 = vrot.slane %v155_v34, 1 }
 0x10b   :  { %v157_v36 = vadd.f32 %v156_v35, %v155_v34 }
 0x10d   :  { %238 = vrcp.f32 %v157_v36 }
 0x11a   :  { %v239_v37 = vpop.eup %238 }
 0x11b   :  { %v159_v38 = vmul.f32 %v239_v37, %v235_v26  ;;  %v160_v39 = vmul.f32 %v239_v37, %v237_v27 }
 0x11d   :  { %161 = vxpose.xlu1.b32.start [1/2] (short) (narrow) %v159_v38, 16 }
 0x121   :  { %162 = vxpose.xlu1.b32.end [2/2] (short) (narrow) %v160_v39, 16 }
 0x199   :  { %v177_v40 = vpop.trf.xlu1 }
 0x19a   :  { %193 = vst.msk [vmem:[#allocation5] sm:$0xff] %vm133_vm1, %v177_v40 }
 0x19d   :  { %v178_v41 = vpop.trf.xlu1 }
 0x19e   :  { %194 = vst.msk [vmem:[#allocation5 + $0x8] sm:$0xff] %vm133_vm1, %v178_v41 }
 0x19f   :  { %271 = shalt.err (!%p268_p9)
}
 0x1a0   :  { %206 = dma.vmem_to_hbm [thread:$0]  %s201_s1, 256, %s342_s3, [#allocation4], %s285_s15, %s285_s15, %s286_s16  }
 0x1a1   :  { %282 = dma.done.wait [#allocation4], 256  }
 0x1a2   :  { %283 = vsyncadd [#allocation4], 4294967040 }
 0x1a3   :  { %210 = vsyncpa [#allocation3], 1 }
 0x1a4   :  { %211 = vsyncpa [#allocation4], 1 }

</bundles_post_ra>
